<compile_context>
chip_gen: v5e
topology: v5e:2x2
jax: 0.10.0
libtpu: 0.0.40
codegen_flags: <defaults>
</compile_context>

<pallas_src>
import jax
import jax.numpy as jnp
from jax.experimental import pallas as pl
from jax.experimental.pallas import tpu as pltpu


# ----------------------------------------------------------------------------
# Pallas kernel: one batch element per grid step.
# ----------------------------------------------------------------------------
def _soft_attention_kernel(q_ref, k_ref, v_ref, wq_ref, bq_ref, wkv_ref,
                           bkv_ref, bias_ref, lamb_ref, out_ref, coef_ref):
    q = q_ref[0]                        # (1, D)
    k = k_ref[0]                        # (N, D)
    v = v_ref[0]                        # (N, D)

    # Consecutive-ratio ("return") features from the torch forward.
    rq = q[:, 1:] / q[:, :-1] - 1.0     # (1, D-1)
    rk = k[:, 1:] / k[:, :-1] - 1.0     # (N, D-1)

    wq = wq_ref[...]                    # (D-1, D)

    # q_proj on both streams (biases folded into one vector add below).
    qp = jnp.dot(rq, wq, preferred_element_type=jnp.float32)               # (1, D)
    kp = jnp.dot(rk, wq, preferred_element_type=jnp.float32)               # (N, D)
    # kv_proj on v.
    vp = jnp.dot(v, wkv_ref[...], preferred_element_type=jnp.float32) \
         + bkv_ref[...]                                                     # (N, D)

    # sigmoid(q_proj(rq) + q_proj(rk) + bias)  ==  sigmoid(qp + kp + (2*bq + bias))
    add_bias = bq_ref[...] + bq_ref[...] + bias_ref[...]                    # (1, D)
    s = jax.nn.sigmoid(qp + kp + add_bias)                                  # (N, D)

    # coef = s @ lamb  (VPU multiply + XLU lane reduce; avoids a degenerate
    # N=1 MXU push).
    coef = jnp.sum(s * lamb_ref[...], axis=-1, keepdims=True)               # (N, 1)

    out_ref[0] = (coef * vp).astype(out_ref.dtype)
    coef_ref[0] = coef.astype(coef_ref.dtype)


# ----------------------------------------------------------------------------
# Wrapper: SoftAttention.forward
# ----------------------------------------------------------------------------
def soft_attention_forward(q, k, v, params, mask=None):
    # TODO(synk): `mask` is accepted for API parity but the torch forward never
    # reads it, so there is nothing to translate.
    wq, bq, wkv, bkv, bias, lamb = params
    B, D = q.shape
    _, N, _ = k.shape

    q3 = q.reshape(B, 1, D)
    bq2, bkv2 = bq.reshape(1, D), bkv.reshape(1, D)
    bias2, lamb2 = bias.reshape(1, D), lamb.reshape(1, D)

    out, coef = pl.pallas_call(
        _soft_attention_kernel,
        out_shape=(
            jax.ShapeDtypeStruct((B, N, D), jnp.float32),
            jax.ShapeDtypeStruct((B, N, 1), jnp.float32),
        ),
        grid_spec=pltpu.PrefetchScalarGridSpec(
            num_scalar_prefetch=0,
            grid=(B,),
            in_specs=[
                pl.BlockSpec((1, 1, D), lambda b: (b, 0, 0)),    # q (reshaped)
                pl.BlockSpec((1, N, D), lambda b: (b, 0, 0)),    # k
                pl.BlockSpec((1, N, D), lambda b: (b, 0, 0)),    # v
                pl.BlockSpec((D - 1, D), lambda b: (0, 0)),      # Wq  (q_proj)
                pl.BlockSpec((1, D), lambda b: (0, 0)),          # bq
                pl.BlockSpec((D, D), lambda b: (0, 0)),          # Wkv (kv_proj)
                pl.BlockSpec((1, D), lambda b: (0, 0)),          # bkv
                pl.BlockSpec((1, D), lambda b: (0, 0)),          # bias param
                pl.BlockSpec((1, D), lambda b: (0, 0)),          # lamb param
            ],
            out_specs=(
                pl.BlockSpec((1, N, D), lambda b: (b, 0, 0)),    # output
                pl.BlockSpec((1, N, 1), lambda b: (b, 0, 0)),    # coef
            ),
        ),
        compiler_params=pltpu.CompilerParams(
            dimension_semantics=("parallel",)),
    )(q3, k, v, wq, bq2, wkv, bkv2, bias2, lamb2)
    return out, coef


# ----------------------------------------------------------------------------
# Pure-JAX reference for correctness check.
# ----------------------------------------------------------------------------
def _reference(q, k, v, params):
    wq, bq, wkv, bkv, bias, lamb = params
    rq = q[:, 1:] / q[:, :-1] - 1.0
    rk = k[:, :, 1:] / k[:, :, :-1] - 1.0
    qp = rq @ wq + bq                        # (B, D)
    kp = rk @ wq + bq                        # (B, N, D)
    vp = v @ wkv + bkv                       # (B, N, D)
    s = jax.nn.sigmoid(qp[:, None, :] + kp + bias)
    coef = s @ lamb                          # (B, N)
    out = coef[..., None] * vp
    return out, coef[..., None]


if __name__ == "__main__":
    B, N, D = 2, 8, 128       # batch, seq, input_dim (lane-dense: D % 128 == 0)

    key = jax.random.PRNGKey(0)
    kq, kk, kv_, k1, k2, k3, k4, k5, k6 = jax.random.split(key, 9)

    # Price-series-like inputs keep the consecutive-ratio denominators away
    # from zero (the torch forward divides adjacent elements).
    q = 1.0 + 0.1 * jax.random.normal(kq, (B, D), dtype=jnp.float32)
    k = 1.0 + 0.1 * jax.random.normal(kk, (B, N, D), dtype=jnp.float32)
    v = jax.random.normal(kv_, (B, N, D), dtype=jnp.float32)

    wq   = 0.1 * jax.random.normal(k1, (D - 1, D), dtype=jnp.float32)   # q_proj weight (in, out)
    bq   = 0.1 * jax.random.normal(k2, (D,), dtype=jnp.float32)         # q_proj bias
    wkv  = 0.1 * jax.random.normal(k3, (D, D), dtype=jnp.float32)       # kv_proj weight (in, out)
    bkv  = 0.1 * jax.random.normal(k4, (D,), dtype=jnp.float32)         # kv_proj bias
    bias = jax.random.normal(k5, (D,), dtype=jnp.float32)               # self.bias
    lamb = jax.random.normal(k6, (D,), dtype=jnp.float32)               # self.lamb
    params = (wq, bq, wkv, bkv, bias, lamb)

    out, coef = soft_attention_forward(q, k, v, params)
    out = jax.block_until_ready(out)
    coef = jax.block_until_ready(coef)
    assert out.shape == (B, N, D), out.shape
    assert coef.shape == (B, N, 1), coef.shape

    ref_out, ref_coef = _reference(q, k, v, params)
    assert jnp.allclose(out, ref_out, atol=1e-4, rtol=1e-4), \
        float(jnp.max(jnp.abs(out - ref_out)))
    assert jnp.allclose(coef, ref_coef, atol=1e-4, rtol=1e-4), \
        float(jnp.max(jnp.abs(coef - ref_coef)))

    print("KERNEL_OK")
</pallas_src>

<mosaic_0001>
module attributes {stable_mosaic.version = 11 : i64} {
  func.func @_soft_attention_kernel(%arg0: i32, %arg1: memref<1x1x128xf32, #tpu.memory_space<vmem>>, %arg2: memref<1x8x128xf32, #tpu.memory_space<vmem>>, %arg3: memref<1x8x128xf32, #tpu.memory_space<vmem>>, %arg4: memref<127x128xf32, #tpu.memory_space<vmem>>, %arg5: memref<1x128xf32, #tpu.memory_space<vmem>>, %arg6: memref<128x128xf32, #tpu.memory_space<vmem>>, %arg7: memref<1x128xf32, #tpu.memory_space<vmem>>, %arg8: memref<1x128xf32, #tpu.memory_space<vmem>>, %arg9: memref<1x128xf32, #tpu.memory_space<vmem>>, %arg10: memref<1x8x128xf32, #tpu.memory_space<vmem>>, %arg11: memref<1x8x1xf32, #tpu.memory_space<vmem>>) attributes {dimension_semantics = [#tpu.dimension_semantics<parallel>], iteration_bounds = array<i64: 2>, scalar_prefetch = 0 : i64, scratch_operands = 0 : i64, tpu.core_type = #tpu.core_type<tc>, window_params = [{transform_indices = @transform_0, window_bounds = array<i64: 1, 1, 128>}, {transform_indices = @transform_1, window_bounds = array<i64: 1, 8, 128>}, {transform_indices = @transform_2, window_bounds = array<i64: 1, 8, 128>}, {pipeline_mode = #tpu.pipeline_mode<synchronous>, transform_indices = @transform_3, window_bounds = array<i64: 127, 128>}, {pipeline_mode = #tpu.pipeline_mode<synchronous>, transform_indices = @transform_4, window_bounds = array<i64: 1, 128>}, {pipeline_mode = #tpu.pipeline_mode<synchronous>, transform_indices = @transform_5, window_bounds = array<i64: 128, 128>}, {pipeline_mode = #tpu.pipeline_mode<synchronous>, transform_indices = @transform_6, window_bounds = array<i64: 1, 128>}, {pipeline_mode = #tpu.pipeline_mode<synchronous>, transform_indices = @transform_7, window_bounds = array<i64: 1, 128>}, {pipeline_mode = #tpu.pipeline_mode<synchronous>, transform_indices = @transform_8, window_bounds = array<i64: 1, 128>}, {transform_indices = @transform_9, window_bounds = array<i64: 1, 8, 128>}, {transform_indices = @transform_10, window_bounds = array<i64: 1, 8, 1>}]} {
    %c0 = arith.constant 0 : index
    %c0_0 = arith.constant 0 : index
    %c0_1 = arith.constant 0 : index
    %0 = vector.load %arg1[%c0, %c0_0, %c0_1] : memref<1x1x128xf32, #tpu.memory_space<vmem>>, vector<1x1x128xf32>
    %1 = vector.shape_cast %0 : vector<1x1x128xf32> to vector<1x128xf32>
    %c0_2 = arith.constant 0 : index
    %c0_3 = arith.constant 0 : index
    %c0_4 = arith.constant 0 : index
    %2 = vector.load %arg2[%c0_2, %c0_3, %c0_4] : memref<1x8x128xf32, #tpu.memory_space<vmem>>, vector<1x8x128xf32>
    %3 = vector.shape_cast %2 : vector<1x8x128xf32> to vector<8x128xf32>
    %c0_5 = arith.constant 0 : index
    %c0_6 = arith.constant 0 : index
    %c0_7 = arith.constant 0 : index
    %4 = vector.load %arg3[%c0_5, %c0_6, %c0_7] : memref<1x8x128xf32, #tpu.memory_space<vmem>>, vector<1x8x128xf32>
    %5 = vector.shape_cast %4 : vector<1x8x128xf32> to vector<8x128xf32>
    %6 = vector.extract_strided_slice %1 {offsets = [0, 1], sizes = [1, 127], strides = [1, 1]} : vector<1x128xf32> to vector<1x127xf32>
    %7 = vector.extract_strided_slice %1 {offsets = [0, 0], sizes = [1, 127], strides = [1, 1]} : vector<1x128xf32> to vector<1x127xf32>
    %8 = arith.divf %6, %7 : vector<1x127xf32>
    %cst = arith.constant 1.000000e+00 : f32
    %9 = vector.broadcast %cst : f32 to vector<1x127xf32>
    %10 = arith.subf %8, %9 : vector<1x127xf32>
    %11 = vector.extract_strided_slice %3 {offsets = [0, 1], sizes = [8, 127], strides = [1, 1]} : vector<8x128xf32> to vector<8x127xf32>
    %12 = vector.extract_strided_slice %3 {offsets = [0, 0], sizes = [8, 127], strides = [1, 1]} : vector<8x128xf32> to vector<8x127xf32>
    %13 = arith.divf %11, %12 : vector<8x127xf32>
    %cst_8 = arith.constant 1.000000e+00 : f32
    %14 = vector.broadcast %cst_8 : f32 to vector<8x127xf32>
    %15 = arith.subf %13, %14 : vector<8x127xf32>
    %c0_9 = arith.constant 0 : index
    %c0_10 = arith.constant 0 : index
    %16 = vector.load %arg4[%c0_9, %c0_10] : memref<127x128xf32, #tpu.memory_space<vmem>>, vector<127x128xf32>
    %cst_11 = arith.constant dense<0.000000e+00> : vector<1x128xf32>
    %17 = tpu.matmul %10, %16, %cst_11 {dimension_numbers = #tpu.dot_dimension_numbers<[1], [0], [0], [1], [0, 0, 1, 1], [], []>} : vector<1x127xf32>, vector<127x128xf32>, vector<1x128xf32> -> vector<1x128xf32>
    %cst_12 = arith.constant dense<0.000000e+00> : vector<8x128xf32>
    %18 = tpu.matmul %15, %16, %cst_12 {dimension_numbers = #tpu.dot_dimension_numbers<[1], [0], [0], [1], [0, 0, 1, 1], [], []>} : vector<8x127xf32>, vector<127x128xf32>, vector<8x128xf32> -> vector<8x128xf32>
    %c0_13 = arith.constant 0 : index
    %c0_14 = arith.constant 0 : index
    %19 = vector.load %arg6[%c0_13, %c0_14] : memref<128x128xf32, #tpu.memory_space<vmem>>, vector<128x128xf32>
    %cst_15 = arith.constant dense<0.000000e+00> : vector<8x128xf32>
    %20 = tpu.matmul %5, %19, %cst_15 {dimension_numbers = #tpu.dot_dimension_numbers<[1], [0], [0], [1], [0, 0, 1, 1], [], []>} : vector<8x128xf32>, vector<128x128xf32>, vector<8x128xf32> -> vector<8x128xf32>
    %c0_16 = arith.constant 0 : index
    %c0_17 = arith.constant 0 : index
    %21 = vector.load %arg7[%c0_16, %c0_17] : memref<1x128xf32, #tpu.memory_space<vmem>>, vector<1x128xf32>
    %22 = vector.broadcast %21 : vector<1x128xf32> to vector<8x128xf32>
    %23 = arith.addf %20, %22 : vector<8x128xf32>
    %c0_18 = arith.constant 0 : index
    %c0_19 = arith.constant 0 : index
    %24 = vector.load %arg5[%c0_18, %c0_19] : memref<1x128xf32, #tpu.memory_space<vmem>>, vector<1x128xf32>
    %c0_20 = arith.constant 0 : index
    %c0_21 = arith.constant 0 : index
    %25 = vector.load %arg5[%c0_20, %c0_21] : memref<1x128xf32, #tpu.memory_space<vmem>>, vector<1x128xf32>
    %26 = arith.addf %24, %25 : vector<1x128xf32>
    %c0_22 = arith.constant 0 : index
    %c0_23 = arith.constant 0 : index
    %27 = vector.load %arg8[%c0_22, %c0_23] : memref<1x128xf32, #tpu.memory_space<vmem>>, vector<1x128xf32>
    %28 = arith.addf %26, %27 : vector<1x128xf32>
    %29 = vector.broadcast %17 : vector<1x128xf32> to vector<8x128xf32>
    %30 = arith.addf %29, %18 : vector<8x128xf32>
    %31 = vector.broadcast %28 : vector<1x128xf32> to vector<8x128xf32>
    %32 = arith.addf %30, %31 : vector<8x128xf32>
    %33 = arith.negf %32 : vector<8x128xf32>
    %34 = math.exp %33 : vector<8x128xf32>
    %cst_24 = arith.constant 1.000000e+00 : f32
    %35 = vector.broadcast %cst_24 : f32 to vector<8x128xf32>
    %36 = arith.addf %35, %34 : vector<8x128xf32>
    %37 = arith.divf %35, %36 : vector<8x128xf32>
    %c0_25 = arith.constant 0 : index
    %c0_26 = arith.constant 0 : index
    %38 = vector.load %arg9[%c0_25, %c0_26] : memref<1x128xf32, #tpu.memory_space<vmem>>, vector<1x128xf32>
    %39 = vector.broadcast %38 : vector<1x128xf32> to vector<8x128xf32>
    %40 = arith.mulf %37, %39 : vector<8x128xf32>
    %cst_27 = arith.constant dense<0.000000e+00> : vector<8xf32>
    %41 = vector.multi_reduction <add>, %40, %cst_27 [1] : vector<8x128xf32> to vector<8xf32>
    %42 = vector.shape_cast %41 : vector<8xf32> to vector<8x1xf32>
    %43 = vector.broadcast %42 : vector<8x1xf32> to vector<8x128xf32>
    %44 = arith.mulf %43, %23 : vector<8x128xf32>
    %c0_28 = arith.constant 0 : index
    %c0_29 = arith.constant 0 : index
    %c0_30 = arith.constant 0 : index
    %45 = vector.load %arg10[%c0_28, %c0_29, %c0_30] : memref<1x8x128xf32, #tpu.memory_space<vmem>>, vector<1x8x128xf32>
    %46 = vector.shape_cast %45 : vector<1x8x128xf32> to vector<8x128xf32>
    %47 = vector.shape_cast %44 : vector<8x128xf32> to vector<1x8x128xf32>
    tpu.vector_store %arg10[%c0_28, %c0_29, %c0_30], %47 {strides = array<i32>} : memref<1x8x128xf32, #tpu.memory_space<vmem>>, vector<1x8x128xf32>,
    %c0_31 = arith.constant 0 : index
    %c0_32 = arith.constant 0 : index
    %c0_33 = arith.constant 0 : index
    %48 = vector.load %arg11[%c0_31, %c0_32, %c0_33] : memref<1x8x1xf32, #tpu.memory_space<vmem>>, vector<1x8x1xf32>
    %49 = vector.shape_cast %48 : vector<1x8x1xf32> to vector<8x1xf32>
    %50 = vector.shape_cast %42 : vector<8x1xf32> to vector<1x8x1xf32>
    tpu.vector_store %arg11[%c0_31, %c0_32, %c0_33], %50 {strides = array<i32>} : memref<1x8x1xf32, #tpu.memory_space<vmem>>, vector<1x8x1xf32>,
    return
  }
  func.func @transform_0(%arg0: i32) -> (i32, i32, i32) {
    %c0_i32 = arith.constant 0 : i32
    %c0_i32_0 = arith.constant 0 : i32
    %c0_i32_1 = arith.constant 0 : i32
    return %arg0, %c0_i32, %c0_i32_0 : i32, i32, i32
  }
  func.func @transform_1(%arg0: i32) -> (i32, i32, i32) {
    %c0_i32 = arith.constant 0 : i32
    %c0_i32_0 = arith.constant 0 : i32
    %c0_i32_1 = arith.constant 0 : i32
    return %arg0, %c0_i32, %c0_i32_0 : i32, i32, i32
  }
  func.func @transform_2(%arg0: i32) -> (i32, i32, i32) {
    %c0_i32 = arith.constant 0 : i32
    %c0_i32_0 = arith.constant 0 : i32
    %c0_i32_1 = arith.constant 0 : i32
    return %arg0, %c0_i32, %c0_i32_0 : i32, i32, i32
  }
  func.func @transform_3(%arg0: i32) -> (i32, i32) {
    %c0_i32 = arith.constant 0 : i32
    %c0_i32_0 = arith.constant 0 : i32
    %c0_i32_1 = arith.constant 0 : i32
    return %c0_i32, %c0_i32_0 : i32, i32
  }
  func.func @transform_4(%arg0: i32) -> (i32, i32) {
    %c0_i32 = arith.constant 0 : i32
    %c0_i32_0 = arith.constant 0 : i32
    %c0_i32_1 = arith.constant 0 : i32
    return %c0_i32, %c0_i32_0 : i32, i32
  }
  func.func @transform_5(%arg0: i32) -> (i32, i32) {
    %c0_i32 = arith.constant 0 : i32
    %c0_i32_0 = arith.constant 0 : i32
    %c0_i32_1 = arith.constant 0 : i32
    return %c0_i32, %c0_i32_0 : i32, i32
  }
  func.func @transform_6(%arg0: i32) -> (i32, i32) {
    %c0_i32 = arith.constant 0 : i32
    %c0_i32_0 = arith.constant 0 : i32
    %c0_i32_1 = arith.constant 0 : i32
    return %c0_i32, %c0_i32_0 : i32, i32
  }
  func.func @transform_7(%arg0: i32) -> (i32, i32) {
    %c0_i32 = arith.constant 0 : i32
    %c0_i32_0 = arith.constant 0 : i32
    %c0_i32_1 = arith.constant 0 : i32
    return %c0_i32, %c0_i32_0 : i32, i32
  }
  func.func @transform_8(%arg0: i32) -> (i32, i32) {
    %c0_i32 = arith.constant 0 : i32
    %c0_i32_0 = arith.constant 0 : i32
    %c0_i32_1 = arith.constant 0 : i32
    return %c0_i32, %c0_i32_0 : i32, i32
  }
  func.func @transform_9(%arg0: i32) -> (i32, i32, i32) {
    %c0_i32 = arith.constant 0 : i32
    %c0_i32_0 = arith.constant 0 : i32
    %c0_i32_1 = arith.constant 0 : i32
    return %arg0, %c0_i32, %c0_i32_0 : i32, i32, i32
  }
  func.func @transform_10(%arg0: i32) -> (i32, i32, i32) {
    %c0_i32 = arith.constant 0 : i32
    %c0_i32_0 = arith.constant 0 : i32
    %c0_i32_1 = arith.constant 0 : i32
    return %arg0, %c0_i32, %c0_i32_0 : i32, i32, i32
  }
}

</mosaic_0001>

<bundles_post_ra>
// kernel: tpu_custom_call.1
= control target key start
LH: loop header
LB: loop body
LE: loop exit
PB: predicated region body
PF: predicated region fallthrough
CT: control target
= control target key end

     0   :  { %s1503_s0 = inlined_call_operand.hbm [shape: f32[2,1,128], index: 0, kind: input, shape index: {}]   ;;  %s1504_s1 = inlined_call_operand.hbm [shape: f32[2,8,128], index: 1, kind: input, shape index: {}]   ;;  %s1505_s2 = inlined_call_operand.hbm [shape: f32[2,8,128], index: 2, kind: input, shape index: {}]   ;;  %s1506_s3 = inlined_call_operand.hbm [shape: f32[127,128], index: 3, kind: input, shape index: {}]   ;;  %s1507_s4 = inlined_call_operand.vmem [shape: f32[1,128], index: 4, kind: input, shape index: {}]   ;;  %s1508_s5 = inlined_call_operand.hbm [shape: f32[128,128], index: 5, kind: input, shape index: {}]   ;;  %s1509_s6 = inlined_call_operand.vmem [shape: f32[1,128], index: 6, kind: input, shape index: {}]   ;;  %s1510_s7 = inlined_call_operand.vmem [shape: f32[1,128], index: 7, kind: input, shape index: {}]   ;;  %s1511_s8 = inlined_call_operand.vmem [shape: f32[1,128], index: 8, kind: input, shape index: {}]   ;;  %s1512_s9 = inlined_call_operand.hbm [shape: f32[2,8,128], index: 9, kind: output, shape index: {0}]   ;;  %s1513_s10 = inlined_call_operand.vmem [shape: f32[2,8,1], index: 10, kind: output, shape index: {1}]  }
   0x1   :  { %1525 = sst [smem:[#allocation22_spill]] %s1504_s1 }
   0x2   :  { %1526 = sst [smem:[#allocation23_spill]] %s1506_s3 }
   0x3   :  { %1527 = sst [smem:[#allocation24_spill]] %s1508_s5 }
   0x4   :  { %1528 = sst [smem:[#allocation25_spill]] %s1513_s10 }
   0x5   :  { %16 = vsyncpa [#allocation3], 0 }
   0x6   :  { %18 = vsyncpa [#allocation3 + $0x1], 0 }
   0x7   :  { %19 = vsyncpa [#allocation6], 0 }
   0x8   :  { %21 = vsyncpa [#allocation6 + $0x1], 0 }
   0x9   :  { %22 = vsyncpa [#allocation9], 0 }
   0xa   :  { %23 = vsyncpa [#allocation4], 0 }
   0xb   :  { %25 = vsyncpa [#allocation4 + $0x1], 0  ;;  %s1267_s13 = smov 0   ;;  %s1269_s14 = smov 0  }
   0xc   :  { %s1271_s15 = smov 0   ;;  %s1273_s16 = smov 0  }
   0xd LB: > { %1529 = sst [smem:[#allocation16_spill]] %s1192_s13  ;;  %s1291_s20 = sadd.s32 4294967295, %s1204_s16   ;;  %s1204_s16 = sphi %s1273_s16, %s1554_s16   ;;  %s1200_s15 = sphi %s1271_s15, %s1556_s15   ;;  %s1196_s14 = sphi %s1269_s14, %s1558_s14   ;;  %s1192_s13 = sphi %s1267_s13, %s1557_s13  }
   0xe   : > { %1530 = sst [smem:[#allocation17_spill]] %s1200_s15  ;;  %p863_p0 = scmp.ge.s32.totalorder %s1204_s16, 1 }
   0xf   : > { %s1531_s3 = sld [smem:[#allocation23_spill]]  ;;  %p1522_p1 = scmp.eq.s32.totalorder %s1291_s20, 0 }
  0x10   : > { %p292_p2 = scmp.lt.s32.totalorder %s1204_s16, 3  ;;  %s1206_s22 = smov [#allocation8]  }
  0x11   : > { %s305_s23 = sshll.u32 %s1206_s22, 4  ;;  %s1514_s25 = smov 128   ;;  %s306_s23 = int_to_ptr.vmem [resolvable:$true] %s305_s23 }
  0x12   : > { %p1296_p3 = pnand %p863_p0, %p292_p2  ;;  %s1515_s26 = smov 8  }
  0x13   : > { %s862_s27 = sadd.s32 4294967294, %s1204_s16   ;;  %s1316_s28 = sadd.s32 1, %s1204_s16  }
  0x14   : > { %p905_p4 = pneg %p1296_p3  ;;  %1534 = sst [smem:[#allocation18_spill]] %s1316_s28 }
  0x15   : > { %s303_s19 = sshll.u32 %s1531_s3, 4  ;;  %s38_s29 = sadd.s32 1, %s1200_s15  ;;  %s304_s19 = int_to_ptr.hbm [resolvable:$true] %s303_s19 }
  0x16   : > { %p1305_p6 = pnand %p905_p4, %p1522_p1  ;;  %s35_s30 = ssub.s32 %s1204_s16, %s1316_s28 }
  0x17   : > { %p45_p7 = scmp.ne.s32.totalorder %s1200_s15, %s1196_s14  ;;  %p36_p8 = scmp.eq.s32.totalorder %s35_s30, 0 }
  0x18   : > { %908 = dma.hbm_to_vmem [thread:$0]  (!%p1305_p6), %s304_s19, 2048, %s306_s23, [#allocation9], %s1514_s25, %s1514_s25, %s1515_s26  }
  0x19   : > { %p46_p9 = scmp.eq.s32.totalorder %s1204_s16, 0  ;;  %p51_p10 = scmp.ne.s32.totalorder %s1196_s14, %s1192_s13 }
  0x1a   : > { %p253_p11 = scmp.eq.s32.totalorder %s1291_s20, 1  ;;  %p259_p2 = scmp.eq.s32.totalorder %s862_s27, 1 }
  0x1b   : > { %s1328_s11 = scalar_select %p36_p8, %s1200_s15, %s38_s29  }
  0x1c   : > { %p47_p12 = por %p46_p9, %p45_p7  ;;  %p1332_p13 = por %p1522_p1, %p51_p10 }
  0x1d   : > { %1535 = sst [smem:[#allocation19_spill]] %s1328_s11  ;;  %p1336_p0 = por %p253_p11, %p45_p7 }
  0x1e   : > { %p928_p4 = scmp.lt.s32.totalorder %s1204_s16, 2  ;;  %s1342_s18 = sand.u32 1, %s1200_s15  }
  0x1f   : > { %s1537_s17 = scalar_select %p1336_p0, 1, 0 }
  0x20   : > { %p1344_p5 = por %p259_p2, %p51_p10  ;;  %s362_s22 = sand.u32 1, %s1204_s16  }
  0x21   : > { %1538 = sst [smem:[#allocation20_spill]] %s1537_s17  ;;  %p1349_p8 = pnand %p928_p4, %p47_p12 }
  0x22   : > { %s1539_s19 = scalar_select %p1344_p5, 1, 0 }
  0x23   : > { %s1521_s29 = sshll.u32 %s1342_s18, 3  ;;  %s868_s30 = sshll.u32 %s1204_s16, 3 }
  0x24   : > { %1540 = sst [smem:[#allocation21_spill]] %s1539_s19  ;;  %s366_s3 = scalar_lea.vmem [#allocation5], %s1521_s29 }
  0x25   : > { %s1542_s1 = sld [smem:[#allocation22_spill]]  ;;  %s374_s11 = sshll.u32 %s366_s3, 4  ;;  %s375_s11 = int_to_ptr.vmem [resolvable:$true] %s374_s11 }
  0x26   : > { %s1360_s28 = scalar_lea.sflag [#allocation6], %s362_s22  ;;  %p1014_p9 = pneg %p1349_p8 }
  0x2b   : > { %s370_s26 = scalar_lea.hbm %s1542_s1, %s868_s30  ;;  %s1017_s29 = scalar_lea.hbm %s1542_s1, 16 }
  0x2c   : > { %s372_s15 = sshll.u32 %s370_s26, 4  ;;  %s373_s15 = int_to_ptr.hbm [resolvable:$true] %s372_s15 }
  0x2d   : > { %s1010_s19 = sshra.s32 %s373_s15, 4  ;;  %s1011_s19 = int_to_ptr.hbm [resolvable:$true] %s1010_s19 }
  0x2e   : > { %s1012_s13 = scalar_lea.hbm %s1011_s19, 8  ;;  %p1018_p12 = scmp.lt.s32.totalorder %s1011_s19, %s1542_s1 }
  0x2f   : > { %p1013_p7 = scmp.ne.s32.totalorder %s1011_s19, %s1012_s13  ;;  %p1019_p2 = scmp.lt.s32.totalorder %s1017_s29, %s1012_s13 }
  0x31   : > { %p1015_p10 = pnand %p1014_p9, %p1013_p7  ;;  %p1020_p4 = por %p1019_p2, %p1018_p12 }
  0x33   : > { %p1016_p11 = pneg %p1015_p10 }
  0x35   : > { %p1021_p1 = pnand %p1020_p4, %p1016_p11 }
  0x37   : > { %1024 = shalt.err (!%p1021_p1)
}
  0x38   : > { %918 = dma.hbm_to_vmem [thread:$0]  (!%p1349_p8), %s373_s15, 128, %s375_s11, %s1360_s28  }
  0x39   : > { %s1379_s25 = scalar_lea.hbm %s1505_s2, %s868_s30  ;;  %s1543_s5 = sld [smem:[#allocation24_spill]] }
  0x3a   : > { %s1209_s19 = smov [#allocation10]   ;;  %s1544_s26 = smov 8  }
  0x3b   : > { %s322_s29 = sshll.u32 %s1209_s19, 4  ;;  %s1545_s1 = smov 128   ;;  %s323_s29 = int_to_ptr.vmem [resolvable:$true] %s322_s29 }
  0x3c   : > { %s351_s17 = scalar_lea.hbm %s1503_s0, %s1204_s16  ;;  %s348_s30 = scalar_lea.vmem [#allocation2], %s1342_s18 }
  0x3d   : > { %s355_s22 = sshll.u32 %s348_s30, 4  ;;  %s353_s10 = sshll.u32 %s351_s17, 4  ;;  %s356_s22 = int_to_ptr.vmem [resolvable:$true] %s355_s22  ;;  %s354_s10 = int_to_ptr.hbm [resolvable:$true] %s353_s10 }
  0x3e   : > { %s391_s27 = sshll.u32 %s1379_s25, 4  ;;  %s346_s3 = scalar_lea.sflag [#allocation3], %s1342_s18  ;;  %s392_s27 = int_to_ptr.hbm [resolvable:$true] %s391_s27 }
  0x3f   : > { %s320_s13 = sshll.u32 %s1543_s5, 4  ;;  %s1070_s5 = sshra.s32 %s354_s10, 4  ;;  %s321_s13 = int_to_ptr.hbm [resolvable:$true] %s320_s13  ;;  %s1071_s5 = int_to_ptr.hbm [resolvable:$true] %s1070_s5 }
  0x40   : > { %911 = dma.hbm_to_vmem [thread:$0]  (!%p1305_p6), %s321_s13, 2048, %s323_s29, [#allocation9], %s1545_s1, %s1545_s1, %s1544_s26  }
  0x41   : > { %s1072_s19 = scalar_lea.hbm %s1071_s5, 1  ;;  %s1077_s13 = scalar_lea.hbm %s1503_s0, 2 }
  0x42   : > { %p1073_p1 = scmp.ne.s32.totalorder %s1071_s5, %s1072_s19  ;;  %p1078_p6 = scmp.lt.s32.totalorder %s1071_s5, %s1503_s0 }
  0x43   : > { %p1079_p11 = scmp.lt.s32.totalorder %s1077_s13, %s1072_s19 }
  0x44   : > { %p1075_p7 = pnand %p1073_p1, %p1014_p9 }
  0x45   : > { %p1080_p12 = por %p1079_p11, %p1078_p6 }
  0x46   : > { %p1076_p10 = pneg %p1075_p7 }
  0x48   : > { %p1081_p2 = pnand %p1080_p12, %p1076_p10 }
  0x4a   : > { %1084 = shalt.err (!%p1081_p2)
}
  0x4b   : > { %915 = dma.hbm_to_vmem [thread:$0]  (!%p1349_p8), %s354_s10, 16, %s356_s22, %s346_s3  }
  0x4c   : > { %s1546_s25 = sshll.u32 %s1342_s18, 3  ;;  %s1100_s17 = sshra.s32 %s392_s27, 4  ;;  %s1101_s17 = int_to_ptr.hbm [resolvable:$true] %s1100_s17 }
  0x4d   : > { %s385_s15 = scalar_lea.vmem [#allocation7], %s1546_s25  ;;  %s1102_s30 = scalar_lea.hbm %s1101_s17, 8 }
  0x4e   : > { %s393_s11 = sshll.u32 %s385_s15, 4  ;;  %p1103_p4 = scmp.ne.s32.totalorder %s1101_s17, %s1102_s30  ;;  %s394_s11 = int_to_ptr.vmem [resolvable:$true] %s393_s11 }
  0x4f   : > { %s1107_s1 = scalar_lea.hbm %s1505_s2, 16  ;;  %p1108_p10 = scmp.lt.s32.totalorder %s1101_s17, %s1505_s2 }
  0x50   : > { %p1105_p1 = pnand %p1103_p4, %p1014_p9  ;;  %p1109_p6 = scmp.lt.s32.totalorder %s1107_s1, %s1102_s30 }
  0x52   : > { %p1106_p7 = pneg %p1105_p1  ;;  %p1110_p11 = por %p1109_p6, %p1108_p10 }
  0x54   : > { %p1111_p12 = pnand %p1110_p11, %p1106_p7 }
  0x56   : > { %1114 = shalt.err (!%p1111_p12)
}
  0x57   : > { %921 = dma.hbm_to_vmem [thread:$0]  (!%p1349_p8), %s392_s27, 128, %s394_s11, %s1360_s28  }
  0x58   : > { %402 = sbr.rel (%p1296_p3) target bundleno = 643 (0x283), region = 56  ;;  %s1424_s10 = sand.u32 (!%p1296_p3), 1, %s1196_s14  }
  0x59   : > { %s405_s18 = scalar_lea.sflag (!%p1296_p3), [#allocation3], %s1424_s10  ;;  %s407_s22 = scalar_lea.vmem (!%p1296_p3), [#allocation2], %s1424_s10 }
  0x5d   : > { %1175 = dma.done.wait (%p1332_p13), %s405_s18, 16  }
  0x5e   : > { %1177 = vsyncadd (%p1332_p13), %s405_s18, 4294967280  ;;  %s413_s28 = sand.u32 1, %s1291_s20   ;;  %s1434_s23 = sshll.u32 %s1424_s10, 3 }
  0x5f   : > { %s414_s21 = scalar_lea.sflag [#allocation6], %s413_s28  ;;  %s417_s27 = scalar_lea.vmem [#allocation5], %s1434_s23 }
  0x60   : > { %1179 = dma.done.wait (%p1332_p13), %s414_s21, 256  }
  0x61   : > { %1181 = vsyncadd (%p1332_p13), %s414_s21, 4294967040  ;;  %s427_s3 = scalar_lea.vmem [#allocation7], %s1434_s23  ;;  %p1547_p3 = scmp.eq.s32.totalorder %s1291_s20, 0 }
  0x63   : > { %1183 = dma.done.wait (%p1547_p3), [#allocation9], 4096   ;;  %p1548_p8 = pmov %p1547_p3 }
  0x64   : > { %v492_v0 = vld [vmem:[%s407_s22] sm:$0x1]  ;;  %s1210_s29 = smov 1   ;;  %v1446_v1 = vld [vmem:[%s417_s27] sm:$0xff]  ;;  %vm558_vm0 = vcmask 1046528   ;;  %v549_v4 = vld [vmem:[#allocation8 + $0x70] sm:$0xff] }
  0x65   : > { %1185 = vsyncadd (%p1548_p8), [#allocation9], 4294963200  ;;  %496 = vrot.lane.b32.xlu0 %v492_v0, %s1210_s29  ;;  %v550_v3 = vld [vmem:[#allocation8 + $0x78] sm:$0x7f]  ;;  %v548_v5 = vld [vmem:[#allocation8 + $0x68] sm:$0xff]  ;;  %s1211_s12 = smov 127  }
  0x66   : > { %880 = vmatpush.msk.msra.mxu0 %vm558_vm0, %v550_v3  ;;  %882 = vmatpush.msk.msra.mxu1 %vm558_vm0, %v550_v3  ;;  %v547_v6 = vld [vmem:[#allocation8 + $0x60] sm:$0xff]  ;;  %v546_v7 = vld [vmem:[#allocation8 + $0x58] sm:$0xff]  ;;  %v545_v11 = vld [vmem:[#allocation8 + $0x50] sm:$0xff]  ;;  %vm555_vm9 = vcmask 1039360   ;;  %p488_p13 = scmp.lt.s32.totalorder %s1291_s20, 1  ;;  %s886_s19 = sshll.u32 %s1291_s20, 3 }
  0x67   : > { %v544_v13 = vld [vmem:[#allocation8 + $0x48] sm:$0xff]  ;;  %v543_v17 = vld [vmem:[#allocation8 + $0x40] sm:$0xff]  ;;  %v542_v19 = vld [vmem:[#allocation8 + $0x38] sm:$0xff]  ;;  %s702_s28 = scalar_lea.hbm %s1512_s9, %s886_s19  ;;  %vm685_vm14 = vcmask 7168   ;;  %s481_s26 = scalar_lea.vmem [#allocation11], %s1434_s23 }
  0x68   : > { %563 = vmatpush.msra.mxu0 %v549_v4  ;;  %588 = vmatpush.msra.mxu1 %v549_v4  ;;  %v541_v24 = vld [vmem:[#allocation8 + $0x30] sm:$0xff]  ;;  %v540_v28 = vld [vmem:[#allocation8 + $0x28] sm:$0xff]  ;;  %v539_v33 = vld [vmem:[#allocation8 + $0x20] sm:$0xff]  ;;  %s489_s5 = scalar_select %p488_p13, %s1291_s20, 1 }
  0x69   : > { %v538_v36 = vld [vmem:[#allocation8 + $0x18] sm:$0xff]  ;;  %v537_v39 = vld [vmem:[#allocation8 + $0x10] sm:$0xff]  ;;  %v536_v42 = vld [vmem:[#allocation8 + $0x8] sm:$0xff]  ;;  %s704_s20 = sshll.u32 %s481_s26, 4  ;;  %s706_s25 = sshll.u32 %s702_s28, 4  ;;  %s705_s20 = int_to_ptr.vmem [resolvable:$true] %s704_s20  ;;  %s707_s25 = int_to_ptr.hbm [resolvable:$true] %s706_s25 }
  0x6a   : > { %564 = vmatpush.msra.mxu0 %v548_v5  ;;  %589 = vmatpush.msra.mxu1 %v548_v5  ;;  %v535_v43 = vld [vmem:[#allocation8] sm:$0xff]  ;;  %v622_v45 = vld [vmem:[#allocation10 + $0x78] sm:$0xff]  ;;  %v621_v46 = vld [vmem:[#allocation10 + $0x70] sm:$0xff]  ;;  %s877_s13 = sshll.u32 %s489_s5, 3  ;;  %s688_s15 = scalar_lea.sflag [#allocation4], %s1424_s10 }
  0x6b   : > { %627 = vmatpush.msra.mxu2 %v622_v45  ;;  %v620_v47 = vld [vmem:[#allocation10 + $0x68] sm:$0xff]  ;;  %v619_v50 = vld [vmem:[#allocation10 + $0x60] sm:$0xff]  ;;  %v618_v51 = vld [vmem:[#allocation10 + $0x58] sm:$0xff]  ;;  %s1144_s11 = sshra.s32 %s707_s25, 4  ;;  %s1150_s23 = scalar_lea.hbm %s1512_s9, 16  ;;  %s1145_s11 = int_to_ptr.hbm [resolvable:$true] %s1144_s11 }
  0x6c   : > { %565 = vmatpush.msra.mxu0 %v547_v6  ;;  %590 = vmatpush.msra.mxu1 %v547_v6  ;;  %v617_v52 = vld [vmem:[#allocation10 + $0x50] sm:$0xff]  ;;  %v616_v53 = vld [vmem:[#allocation10 + $0x48] sm:$0xff]  ;;  %v615_v54 = vld [vmem:[#allocation10 + $0x40] sm:$0xff]  ;;  %s1146_s17 = scalar_lea.hbm %s1145_s11, 8  ;;  %p1151_p1 = scmp.lt.s32.totalorder %s1145_s11, %s1512_s9 }
  0x6d   : > { %516 = vrot.lane.b32.xlu0 %v1446_v1, %s1210_s29  ;;  %628 = vmatpush.msra.mxu2 %v621_v46  ;;  %v614_v55 = vld [vmem:[#allocation10 + $0x38] sm:$0xff]  ;;  %v613_v56 = vld [vmem:[#allocation10 + $0x30] sm:$0xff]  ;;  %v612_v57 = vld [vmem:[#allocation10 + $0x28] sm:$0xff]  ;;  %p1147_p9 = scmp.ne.s32.totalorder %s1145_s11, %s1146_s17  ;;  %p1152_p7 = scmp.lt.s32.totalorder %s1150_s23, %s1146_s17 }
  0x6e   : > { %566 = vmatpush.msra.mxu0 %v546_v7  ;;  %591 = vmatpush.msra.mxu1 %v546_v7  ;;  %v611_v58 = vld [vmem:[#allocation10 + $0x20] sm:$0xff]  ;;  %v610_v59 = vld [vmem:[#allocation10 + $0x18] sm:$0xff]  ;;  %v609_v60 = vld [vmem:[#allocation10 + $0x10] sm:$0xff] }
  0x6f   : > { %629 = vmatpush.msra.mxu2 %v620_v47  ;;  %v608_v61 = vld [vmem:[#allocation10 + $0x8] sm:$0xff]  ;;  %v607_v62 = vld [vmem:[#allocation10] sm:$0xff]  ;;  %v494_v63 = vld [vmem:[%s427_s3] sm:$0xff]  ;;  %s1549_s3 = sld [smem:[#allocation25_spill]]  ;;  %p1148_p2 = pnand %p1147_p9, %p1336_p0 }
  0x70   : > { %567 = vmatpush.msra.mxu0 %v545_v11  ;;  %592 = vmatpush.msra.mxu1 %v545_v11  ;;  %p1153_p10 = por %p1152_p7, %p1151_p1 }
  0x71   : > { %630 = vmatpush.msra.mxu2 %v619_v50  ;;  %p1149_p4 = pneg %p1148_p2 }
  0x72   : > { %568 = vmatpush.msra.mxu0 %v544_v13  ;;  %593 = vmatpush.msra.mxu1 %v544_v13 }
  0x73   : > { %631 = vmatpush.msra.mxu2 %v618_v51  ;;  %p1154_p6 = pnand %p1153_p10, %p1149_p4 }
  0x74   : > { %569 = vmatpush.msra.mxu0 %v543_v17  ;;  %594 = vmatpush.msra.mxu1 %v543_v17 }
  0x75   : > { %632 = vmatpush.msra.mxu2 %v617_v52  ;;  %s491_s29 = scalar_lea.vmem %s1549_s3, %s877_s13 }
  0x76   : > { %570 = vmatpush.msra.mxu0 %v542_v19  ;;  %595 = vmatpush.msra.mxu1 %v542_v19 }
  0x77   : > { %633 = vmatpush.msra.mxu2 %v616_v53 }
  0x78   : > { %571 = vmatpush.msra.mxu0 %v541_v24  ;;  %596 = vmatpush.msra.mxu1 %v541_v24 }
  0x79   : > { %634 = vmatpush.msra.mxu2 %v615_v54 }
  0x7a   : > { %572 = vmatpush.msra.mxu0 %v540_v28  ;;  %597 = vmatpush.msra.mxu1 %v540_v28 }
  0x7b   : > { %635 = vmatpush.msra.mxu2 %v614_v55 }
  0x7c   : > { %573 = vmatpush.msra.mxu0 %v539_v33  ;;  %598 = vmatpush.msra.mxu1 %v539_v33 }
  0x7d   : > { %636 = vmatpush.msra.mxu2 %v613_v56 }
  0x7e   : > { %574 = vmatpush.msra.mxu0 %v538_v36  ;;  %599 = vmatpush.msra.mxu1 %v538_v36 }
  0x7f   : > { %637 = vmatpush.msra.mxu2 %v612_v57 }
  0x80   : > { %575 = vmatpush.msra.mxu0 %v537_v39  ;;  %600 = vmatpush.msra.mxu1 %v537_v39 }
  0x81   : > { %638 = vmatpush.msra.mxu2 %v611_v58 }
  0x82   : > { %576 = vmatpush.msra.mxu0 %v536_v42  ;;  %601 = vmatpush.msra.mxu1 %v536_v42 }
  0x83   : > { %639 = vmatpush.msra.mxu2 %v610_v59 }
  0x84   : > { %577 = vmatpush.msra.mxu0 %v535_v43  ;;  %602 = vmatpush.msra.mxu1 %v535_v43 }
  0x85   : > { %640 = vmatpush.msra.mxu2 %v609_v60 }
  0x87   : > { %641 = vmatpush.msra.mxu2 %v608_v61 }
  0x89   : > { %642 = vmatpush.msra.mxu2 %v607_v62 }
  0x8a   : > { %643 = vmatmul.f32.vlgmr.msra.gmra.mxu2 %v494_v63 }
  0xd7   : > { %v497_v2 = vpop.permute.xlu0 %496 }
  0xd8   : > { %972 = vrcp.f32 %v497_v2  ;;  %v510_v14 = vand.u32 2147483648, %v497_v2  ;;  %v508_v16 = vand.u32 2147483647, %v497_v2  ;;  %vm504_vm2 = vweird.f32 %v497_v2 }
  0xda   : > { %v511_v21 = vor.u32 1.1754944e-38, %v510_v14  ;;  %vm509_vm4 = vcmp.eq.f32.partialorder %v508_v16, 8.507059e+37 }
  0xde   : > { %v973_v8 = vpop.eup %972 }
  0xdf   : > { %v500_v9 = vmul.f32 %v973_v8, %v497_v2  ;;  %v517_v10 = vpop.permute.xlu0 %516  ;;  %vm505_vm1 = vweird.f32 %v973_v8  ;;  %v649_v2 = vld [vmem:[%s1510_s7] sm:$0x1] }
  0xe0   : > { %974 = vrcp.f32 %v517_v10  ;;  %vm506_vm3 = vmor %vm504_vm2, %vm505_vm1  ;;  %v530_v29 = vand.u32 2147483648, %v517_v10  ;;  %v528_v31 = vand.u32 2147483647, %v517_v10  ;;  %vm524_vm6 = vweird.f32 %v517_v10 }
  0xe1   : > { %v501_v12 = vsub.f32 1.0, %v500_v9 }
  0xe2   : > { %v531_v37 = vor.u32 1.1754944e-38, %v530_v29  ;;  %vm529_vm8 = vcmp.eq.f32.partialorder %v528_v31, 8.507059e+37 }
  0xe3   : > { %v502_v15 = vmul.f32 %v973_v8, %v501_v12 }
  0xe5   : > { %v503_v18 = vadd.f32 %v973_v8, %v502_v15 }
  0xe6   : > { %v975_v20 = vpop.eup %974 }
  0xe7   : > { %v520_v22 = vmul.f32 %v975_v20, %v517_v10  ;;  %v507_v23 = vsel %vm506_vm3, %v973_v8, %v503_v18  ;;  %vm525_vm5 = vweird.f32 %v975_v20 }
  0xe8   : > { %v512_v25 = vsel %vm509_vm4, %v511_v21, %v507_v23  ;;  %vm526_vm7 = vmor %vm524_vm6, %vm525_vm5 }
  0xe9   : > { %v521_v26 = vsub.f32 1.0, %v520_v22  ;;  %v513_v27 = vmul.f32 %v512_v25, %v492_v0  ;;  %v647_v0 = vld [vmem:[%s1507_s4] sm:$0x1] }
  0xea   : > { %v971_v25 = vld [vmem:[%s1509_s6] ss:$0 sm:$0xff] }
  0xeb   : > { %v522_v30 = vmul.f32 %v975_v20, %v521_v26  ;;  %v878_v32 = vadd.f32 -1.0, %v513_v27 }
  0xed   : > { %v523_v34 = vadd.f32 %v975_v20, %v522_v30  ;;  %v552_v35 = vperm.slane %v878_v32, 0 }
  0xef   : > { %553 = vrot.lane.b32.xlu1 %v552_v35, %s1211_s12  ;;  %v527_v38 = vsel %vm526_vm7, %v975_v20, %v523_v34  ;;  %v970_v20 = vld [vmem:[%s1511_s8] ss:$0 sm:$0xff] }
  0xf0   : > { %v532_v40 = vsel %vm529_vm8, %v531_v37, %v527_v38 }
  0xf1   : > { %v533_v41 = vmul.f32 %v532_v40, %v1446_v1  ;;  %v648_v1 = vadd.f32 %v647_v0, %v647_v0 }
  0xf3   : > { %v879_v44 = vadd.f32 -1.0, %v533_v41  ;;  %v650_v3 = vadd.f32 %v649_v2, %v648_v1 }
  0xf5   : > { %v654_v6 = vperm.slane %v650_v3, 0 }
  0xf7   : > { %583 = vrot.lane.b32.xlu1 %v879_v44, %s1211_s12 }
 0x10d   : > { %v644_v26 = vpop.f32.mrf.mxu2 }
 0x10e   : > { %v645_v27 = vadd.f32 %v971_v25, %v644_v26 }
 0x161   : > { %v554_v48 = vpop.permute.xlu1 %553 }
 0x162   : > { %881 = vmatmul.msk.f32.vlgmr.msra.gmra.mxu0 %vm555_vm9, %v554_v48 }
 0x169   : > { %v584_v49 = vpop.permute.xlu1 %583 }
 0x16a   : > { %883 = vmatmul.msk.f32.vlgmr.msra.gmra.mxu1 %vm555_vm9, %v584_v49 }
 0x1df   : > { %v579_v4 = vpop.f32.mrf.mxu0 }
 0x1e0   : > { %v651_v5 = vperm.slane %v579_v4, 0 }
 0x1e7   : > { %v604_v7 = vpop.f32.mrf.mxu1 }
 0x1e8   : > { %v652_v8 = vadd.f32 %v651_v5, %v604_v7 }
 0x1ea   : > { %v656_v9 = vadd.f32 %v654_v6, %v652_v8 }
 0x1ec   : > { %v884_v10 = vmul.f32 -1.442695, %v656_v9 }
 0x1ee   : > { %976 = vpow2.f32 %v884_v10 }
 0x1f4   : > { %v977_v11 = vpop.eup %976 }
 0x1f5   : > { %v660_v12 = vadd.f32 1.0, %v977_v11 }
 0x1f7   : > { %978 = vrcp.f32 %v660_v12  ;;  %v672_v16 = vand.u32 2147483648, %v660_v12  ;;  %v670_v18 = vand.u32 2147483647, %v660_v12  ;;  %vm666_vm11 = vweird.f32 %v660_v12 }
 0x1f9   : > { %v673_v21 = vor.u32 1.1754944e-38, %v672_v16  ;;  %vm671_vm13 = vcmp.eq.f32.partialorder %v670_v18, 8.507059e+37 }
 0x1fd   : > { %v979_v13 = vpop.eup %978 }
 0x1fe   : > { %v662_v14 = vmul.f32 %v979_v13, %v660_v12  ;;  %vm667_vm10 = vweird.f32 %v979_v13 }
 0x1ff   : > { %vm668_vm12 = vmor %vm666_vm11, %vm667_vm10 }
 0x200   : > { %v663_v15 = vsub.f32 1.0, %v662_v14 }
 0x202   : > { %v664_v17 = vmul.f32 %v979_v13, %v663_v15 }
 0x204   : > { %v665_v19 = vadd.f32 %v979_v13, %v664_v17 }
 0x206   : > { %v669_v22 = vsel %vm668_vm12, %v979_v13, %v665_v19 }
 0x207   : > { %v674_v23 = vsel %vm671_vm13, %v673_v21, %v669_v22 }
 0x208   : > { %v680_v24 = vmul.f32 %v970_v20, %v674_v23 }
 0x20a   : > { %681 = vadd.xlane.f32.xlu2 %v680_v24 }
 0x27d   : > { %v682_v28 = vpop.xlane.xlu2 %681 }
 0x27e   : > { %v683_v29 = vmul.f32 %v682_v28, %v645_v27  ;;  %686 = vst.msk [vmem:[%s491_s29] sm:$0xff] %vm685_vm14, %v682_v28 }
 0x280   : > { %684 = vst [vmem:[%s481_s26] sm:$0xff] %v683_v29 }
 0x281   : > { %1157 = shalt.err (!%p1154_p6)
}
 0x282   : > { %903 = dma.vmem_to_hbm [thread:$0]  (%p1336_p0), %s705_s20, 128, %s707_s25, %s688_s15  }
 0x283 PF: > { %s1551_s10 = sld [smem:[#allocation16_spill]]  ;;  %p1553_p11 = scmp.ge.s32.totalorder %s1204_s16, 2 }
 0x285   : > { %p923_p12 = pnand %p1553_p11, %p1344_p5 }
 0x287   : > { %p924_p3 = pneg %p923_p12 }
 0x289   : > { %s721_s13 = sand.u32 1, %s1551_s10  }
 0x28a   : > { %s722_s18 = scalar_lea.sflag [#allocation4], %s721_s13 }
 0x28b   : > { %1187 = dma.done.wait (%p924_p3), %s722_s18, 128  }
 0x28c   : > { %1189 = vsyncadd (%p924_p3), %s722_s18, 4294967168  ;;  %s1554_s16 = sld [smem:[#allocation18_spill]]  ;;  %s1557_s13 = smov %s1196_s14 }
 0x28d   : > { %s1555_s22 = sld [smem:[#allocation17_spill]] }
 0x28e   : > { %s1556_s15 = sld [smem:[#allocation19_spill]] }
 0x292   : > { %p28_p8 = scmp.ge.s32.totalorder %s1554_s16, 4  }
 0x293   : > { %s1558_s14 = smov %s1555_s22 }
 0x294   :  { %30 = sbr.rel (!%p28_p8) target bundleno = 13 (0xd), region = 145 }
 0x299   :  { %735 = vsyncpa [#allocation3], 1 }
 0x29a   :  { %737 = vsyncpa [#allocation3 + $0x1], 1 }
 0x29b   :  { %738 = vsyncpa [#allocation6], 1 }
 0x29c   :  { %740 = vsyncpa [#allocation6 + $0x1], 1 }
 0x29d   :  { %741 = vsyncpa [#allocation9], 1 }
 0x29e   :  { %742 = vsyncpa [#allocation4], 1 }
 0x29f   :  { %744 = vsyncpa [#allocation4 + $0x1], 1 }

</bundles_post_ra>
